<compile_context>
chip_gen: v5e
topology: v5e:2x2
jax: 0.10.0
libtpu: 0.0.40
codegen_flags: <defaults>
</compile_context>

<pallas_src>
import functools

import jax
import jax.numpy as jnp
from jax.experimental import pallas as pl
from jax.experimental.pallas import tpu as pltpu


def _round_up(x: int, m: int) -> int:
    return ((x + m - 1) // m) * m


def _cwl_kernel(p_ref, rg_ref, out_ref, *, D: int, node_idx: int,
                sigma: float, criterion_mode: str):
    """One grid step processes TB batch elements.

    p_ref  : (6+D, TB, N)  packed [x(3); target(3); Xi(D)], point axis on lanes
    rg_ref : (TB, 12)      rows 0..2 of each 4x4 rigid transform, row-major
    out_ref: (TB, 1)       per-batch-element loss (min over points)
    """
    x0, x1, x2 = p_ref[0], p_ref[1], p_ref[2]      # (TB, N) each
    t0, t1, t2 = p_ref[3], p_ref[4], p_ref[5]      # (TB, N) each
    rg = rg_ref[...]                               # (TB, 12)

    def rcol(j):                                   # (TB, 1) -> lane-broadcast
        return rg[:, j:j + 1]

    # ---- GeometricReconstructionLoss: rigid transform as VPU broadcast FMAs
    d0 = rcol(0) * x0 + rcol(1) * x1 + rcol(2) * x2 + rcol(3) - t0
    d1 = rcol(4) * x0 + rcol(5) * x1 + rcol(6) * x2 + rcol(7) - t1
    d2 = rcol(8) * x0 + rcol(9) * x1 + rcol(10) * x2 + rcol(11) - t2
    if criterion_mode == 'l1':
        recon = jnp.abs(d0) + jnp.abs(d1) + jnp.abs(d2)            # (TB, N)
    else:  # 'l2'
        recon = d0 * d0 + d1 * d1 + d2 * d2                        # (TB, N)

    # ---- GeometricSpatialRelationLoss (relative to static node_idx)
    nd = slice(node_idx, node_idx + 1)
    dp0, dp1, dp2 = x0 - x0[:, nd], x1 - x1[:, nd], x2 - x2[:, nd]
    dt0, dt1, dt2 = t0 - t0[:, nd], t1 - t1[:, nd], t2 - t2[:, nd]
    w = jnp.exp(-(dt0 * dt0 + dt1 * dt1 + dt2 * dt2) / (2.0 * sigma * sigma))
    r0, r1, r2 = dp0 - dt0, dp1 - dt1, dp2 - dt2
    if criterion_mode == 'l1':
        spatial = w * (jnp.abs(r0) + jnp.abs(r1) + jnp.abs(r2))
    else:
        spatial = w * (r0 * r0 + r1 * r1 + r2 * r2)

    # ---- conditional weighting: 1 / exp(||Xi_n||_2)
    xi_sq = p_ref[6] * p_ref[6]
    for d in range(1, D):
        xi_sq = xi_sq + p_ref[6 + d] * p_ref[6 + d]
    total = (recon + spatial) * jnp.exp(-jnp.sqrt(xi_sq))          # (TB, N)

    # per-batch min over the point (lane) axis
    out_ref[...] = jnp.min(total, axis=1, keepdims=True)           # (TB, 1)


def conditional_weighting_loss(X_v, target_X_v, rig_trans_matrix, Xi,
                               node_idx: int, sigma: float = 5.0,
                               criterion_mode: str = 'l2'):
    """X_v, target_X_v: [B, N, 3]; rig_trans_matrix: [B, 4, 4]; Xi: [B, N, D]."""
    B, N, _ = X_v.shape
    D = Xi.shape[-1]
    C = 6 + D

    # Single packing producer: one transpose+concat pass over all inputs,
    # component-major so the point axis lands on the 128-lane axis.
    packed = jnp.concatenate([X_v, target_X_v, Xi], axis=-1).astype(jnp.float32)  # [B,N,C]
    packed = jnp.transpose(packed, (2, 0, 1))                                     # [C,B,N]

    # Only the top 3 rows (rotation + translation) of the 4x4 are needed.
    rig = rig_trans_matrix.astype(jnp.float32)[:, :3, :4].reshape(B, 12)          # [B,12]

    # Batch tile: ~2 MB per packed block (double-buffered -> ~4 MB VMEM),
    # multiple of 8 for the sublane axis.
    # TODO(synk): tile N as a second, last, "arbitrary" grid axis with a
    # running-min scratch and +inf lane masking if N ever exceeds one block.
    row_bytes = C * N * 4
    tb = max(8, min(512, (2 * 1024 * 1024) // row_bytes))
    tb = (tb // 8) * 8
    tb = min(tb, _round_up(B, 8))
    b_pad = _round_up(B, tb)
    grid = b_pad // tb

    if b_pad != B:
        # Zero-padded batches produce finite (zero) minima and are dropped below.
        packed = jnp.pad(packed, ((0, 0), (0, b_pad - B), (0, 0)))
        rig = jnp.pad(rig, ((0, b_pad - B), (0, 0)))

    kernel = functools.partial(_cwl_kernel, D=D, node_idx=int(node_idx),
                               sigma=float(sigma), criterion_mode=criterion_mode)

    per_batch = pl.pallas_call(
        kernel,
        out_shape=jax.ShapeDtypeStruct((b_pad, 1), jnp.float32),
        grid=(grid,),
        in_specs=[
            pl.BlockSpec((C, tb, N), lambda b: (0, b, 0)),
            pl.BlockSpec((tb, 12), lambda b: (b, 0)),
        ],
        out_specs=pl.BlockSpec((tb, 1), lambda b: (b, 0)),
        compiler_params=pltpu.CompilerParams(
            dimension_semantics=("parallel",)),   # disjoint per-step outputs
    )(packed, rig)

    return jnp.sum(per_batch[:B, 0]) / B


def _reference(X_v, target_X_v, rig, Xi, node_idx, sigma=5.0, criterion_mode='l2'):
    """Pure-JAX reference of the same (assumed) semantics, for validation."""
    def per_b(x, t, m, xi):
        x_hat = x @ m[:3, :3].T + m[:3, 3]
        diff = x_hat - t
        dp = x - x[node_idx]
        dt = t - t[node_idx]
        rel = dp - dt
        w = jnp.exp(-jnp.sum(dt ** 2, axis=-1) / (2.0 * sigma * sigma))
        if criterion_mode == 'l1':
            recon = jnp.sum(jnp.abs(diff), axis=-1)
            spatial = w * jnp.sum(jnp.abs(rel), axis=-1)
        else:
            recon = jnp.sum(diff ** 2, axis=-1)
            spatial = w * jnp.sum(rel ** 2, axis=-1)
        xin = jnp.sqrt(jnp.sum(xi ** 2, axis=-1))
        return jnp.min((recon + spatial) * jnp.exp(-xin))
    vals = jax.vmap(per_b)(X_v, target_X_v, rig, Xi)
    return jnp.sum(vals) / X_v.shape[0]


if __name__ == "__main__":
    key = jax.random.PRNGKey(0)
    k1, k2, k3, k4 = jax.random.split(key, 4)

    B, N, D = 4, 128, 8       # batch, points per sample, Xi feature dim
    node_idx = 3
    sigma = 5.0

    X_v = jax.random.normal(k1, (B, N, 3), dtype=jnp.float32)
    target_X_v = jax.random.normal(k2, (B, N, 3), dtype=jnp.float32)
    Xi = jax.random.normal(k3, (B, N, D), dtype=jnp.float32)

    # Deterministic rigid transforms: identity + small perturbation, homogeneous 4x4.
    rig = jnp.tile(jnp.eye(4, dtype=jnp.float32)[None], (B, 1, 1))
    pert = 0.1 * jax.random.normal(k4, (B, 3, 4), dtype=jnp.float32)
    rig = rig.at[:, :3, :].add(pert)

    for mode in ('l2', 'l1'):
        out = conditional_weighting_loss(X_v, target_X_v, rig, Xi,
                                         node_idx=node_idx, sigma=sigma,
                                         criterion_mode=mode)
        out = jax.block_until_ready(out)
        ref = _reference(X_v, target_X_v, rig, Xi, node_idx, sigma, mode)
        assert jnp.allclose(out, ref, rtol=1e-5, atol=1e-5), (mode, out, ref)

    print("KERNEL_OK")
</pallas_src>

<mosaic_0001>
module attributes {stable_mosaic.version = 11 : i64} {
  func.func @_cwl_kernel(%arg0: i32, %arg1: memref<14x8x128xf32, #tpu.memory_space<vmem>>, %arg2: memref<8x12xf32, #tpu.memory_space<vmem>>, %arg3: memref<8x1xf32, #tpu.memory_space<vmem>>) attributes {dimension_semantics = [#tpu.dimension_semantics<parallel>], iteration_bounds = array<i64: 1>, scalar_prefetch = 0 : i64, scratch_operands = 0 : i64, tpu.core_type = #tpu.core_type<tc>, window_params = [{transform_indices = @transform_0, window_bounds = array<i64: 14, 8, 128>}, {transform_indices = @transform_1, window_bounds = array<i64: 8, 12>}, {transform_indices = @transform_2, window_bounds = array<i64: 8, 1>}]} {
    %c0 = arith.constant 0 : index
    %c0_0 = arith.constant 0 : index
    %c0_1 = arith.constant 0 : index
    %0 = vector.load %arg1[%c0, %c0_0, %c0_1] : memref<14x8x128xf32, #tpu.memory_space<vmem>>, vector<1x8x128xf32>
    %1 = vector.shape_cast %0 : vector<1x8x128xf32> to vector<8x128xf32>
    %c1 = arith.constant 1 : index
    %c0_2 = arith.constant 0 : index
    %c0_3 = arith.constant 0 : index
    %2 = vector.load %arg1[%c1, %c0_2, %c0_3] : memref<14x8x128xf32, #tpu.memory_space<vmem>>, vector<1x8x128xf32>
    %3 = vector.shape_cast %2 : vector<1x8x128xf32> to vector<8x128xf32>
    %c2 = arith.constant 2 : index
    %c0_4 = arith.constant 0 : index
    %c0_5 = arith.constant 0 : index
    %4 = vector.load %arg1[%c2, %c0_4, %c0_5] : memref<14x8x128xf32, #tpu.memory_space<vmem>>, vector<1x8x128xf32>
    %5 = vector.shape_cast %4 : vector<1x8x128xf32> to vector<8x128xf32>
    %c3 = arith.constant 3 : index
    %c0_6 = arith.constant 0 : index
    %c0_7 = arith.constant 0 : index
    %6 = vector.load %arg1[%c3, %c0_6, %c0_7] : memref<14x8x128xf32, #tpu.memory_space<vmem>>, vector<1x8x128xf32>
    %7 = vector.shape_cast %6 : vector<1x8x128xf32> to vector<8x128xf32>
    %c4 = arith.constant 4 : index
    %c0_8 = arith.constant 0 : index
    %c0_9 = arith.constant 0 : index
    %8 = vector.load %arg1[%c4, %c0_8, %c0_9] : memref<14x8x128xf32, #tpu.memory_space<vmem>>, vector<1x8x128xf32>
    %9 = vector.shape_cast %8 : vector<1x8x128xf32> to vector<8x128xf32>
    %c5 = arith.constant 5 : index
    %c0_10 = arith.constant 0 : index
    %c0_11 = arith.constant 0 : index
    %10 = vector.load %arg1[%c5, %c0_10, %c0_11] : memref<14x8x128xf32, #tpu.memory_space<vmem>>, vector<1x8x128xf32>
    %11 = vector.shape_cast %10 : vector<1x8x128xf32> to vector<8x128xf32>
    %c0_12 = arith.constant 0 : index
    %c0_13 = arith.constant 0 : index
    %12 = vector.load %arg2[%c0_12, %c0_13] : memref<8x12xf32, #tpu.memory_space<vmem>>, vector<8x12xf32>
    %13 = vector.extract_strided_slice %12 {offsets = [0, 0], sizes = [8, 1], strides = [1, 1]} : vector<8x12xf32> to vector<8x1xf32>
    %14 = vector.broadcast %13 : vector<8x1xf32> to vector<8x128xf32>
    %15 = arith.mulf %14, %1 : vector<8x128xf32>
    %16 = vector.extract_strided_slice %12 {offsets = [0, 1], sizes = [8, 1], strides = [1, 1]} : vector<8x12xf32> to vector<8x1xf32>
    %17 = vector.broadcast %16 : vector<8x1xf32> to vector<8x128xf32>
    %18 = arith.mulf %17, %3 : vector<8x128xf32>
    %19 = arith.addf %15, %18 : vector<8x128xf32>
    %20 = vector.extract_strided_slice %12 {offsets = [0, 2], sizes = [8, 1], strides = [1, 1]} : vector<8x12xf32> to vector<8x1xf32>
    %21 = vector.broadcast %20 : vector<8x1xf32> to vector<8x128xf32>
    %22 = arith.mulf %21, %5 : vector<8x128xf32>
    %23 = arith.addf %19, %22 : vector<8x128xf32>
    %24 = vector.extract_strided_slice %12 {offsets = [0, 3], sizes = [8, 1], strides = [1, 1]} : vector<8x12xf32> to vector<8x1xf32>
    %25 = vector.broadcast %24 : vector<8x1xf32> to vector<8x128xf32>
    %26 = arith.addf %23, %25 : vector<8x128xf32>
    %27 = arith.subf %26, %7 : vector<8x128xf32>
    %28 = vector.extract_strided_slice %12 {offsets = [0, 4], sizes = [8, 1], strides = [1, 1]} : vector<8x12xf32> to vector<8x1xf32>
    %29 = vector.broadcast %28 : vector<8x1xf32> to vector<8x128xf32>
    %30 = arith.mulf %29, %1 : vector<8x128xf32>
    %31 = vector.extract_strided_slice %12 {offsets = [0, 5], sizes = [8, 1], strides = [1, 1]} : vector<8x12xf32> to vector<8x1xf32>
    %32 = vector.broadcast %31 : vector<8x1xf32> to vector<8x128xf32>
    %33 = arith.mulf %32, %3 : vector<8x128xf32>
    %34 = arith.addf %30, %33 : vector<8x128xf32>
    %35 = vector.extract_strided_slice %12 {offsets = [0, 6], sizes = [8, 1], strides = [1, 1]} : vector<8x12xf32> to vector<8x1xf32>
    %36 = vector.broadcast %35 : vector<8x1xf32> to vector<8x128xf32>
    %37 = arith.mulf %36, %5 : vector<8x128xf32>
    %38 = arith.addf %34, %37 : vector<8x128xf32>
    %39 = vector.extract_strided_slice %12 {offsets = [0, 7], sizes = [8, 1], strides = [1, 1]} : vector<8x12xf32> to vector<8x1xf32>
    %40 = vector.broadcast %39 : vector<8x1xf32> to vector<8x128xf32>
    %41 = arith.addf %38, %40 : vector<8x128xf32>
    %42 = arith.subf %41, %9 : vector<8x128xf32>
    %43 = vector.extract_strided_slice %12 {offsets = [0, 8], sizes = [8, 1], strides = [1, 1]} : vector<8x12xf32> to vector<8x1xf32>
    %44 = vector.broadcast %43 : vector<8x1xf32> to vector<8x128xf32>
    %45 = arith.mulf %44, %1 : vector<8x128xf32>
    %46 = vector.extract_strided_slice %12 {offsets = [0, 9], sizes = [8, 1], strides = [1, 1]} : vector<8x12xf32> to vector<8x1xf32>
    %47 = vector.broadcast %46 : vector<8x1xf32> to vector<8x128xf32>
    %48 = arith.mulf %47, %3 : vector<8x128xf32>
    %49 = arith.addf %45, %48 : vector<8x128xf32>
    %50 = vector.extract_strided_slice %12 {offsets = [0, 10], sizes = [8, 1], strides = [1, 1]} : vector<8x12xf32> to vector<8x1xf32>
    %51 = vector.broadcast %50 : vector<8x1xf32> to vector<8x128xf32>
    %52 = arith.mulf %51, %5 : vector<8x128xf32>
    %53 = arith.addf %49, %52 : vector<8x128xf32>
    %54 = vector.extract_strided_slice %12 {offsets = [0, 11], sizes = [8, 1], strides = [1, 1]} : vector<8x12xf32> to vector<8x1xf32>
    %55 = vector.broadcast %54 : vector<8x1xf32> to vector<8x128xf32>
    %56 = arith.addf %53, %55 : vector<8x128xf32>
    %57 = arith.subf %56, %11 : vector<8x128xf32>
    %58 = arith.mulf %27, %27 : vector<8x128xf32>
    %59 = arith.mulf %42, %42 : vector<8x128xf32>
    %60 = arith.addf %58, %59 : vector<8x128xf32>
    %61 = arith.mulf %57, %57 : vector<8x128xf32>
    %62 = arith.addf %60, %61 : vector<8x128xf32>
    %63 = vector.extract_strided_slice %1 {offsets = [0, 3], sizes = [8, 1], strides = [1, 1]} : vector<8x128xf32> to vector<8x1xf32>
    %64 = vector.broadcast %63 : vector<8x1xf32> to vector<8x128xf32>
    %65 = arith.subf %1, %64 : vector<8x128xf32>
    %66 = vector.extract_strided_slice %3 {offsets = [0, 3], sizes = [8, 1], strides = [1, 1]} : vector<8x128xf32> to vector<8x1xf32>
    %67 = vector.broadcast %66 : vector<8x1xf32> to vector<8x128xf32>
    %68 = arith.subf %3, %67 : vector<8x128xf32>
    %69 = vector.extract_strided_slice %5 {offsets = [0, 3], sizes = [8, 1], strides = [1, 1]} : vector<8x128xf32> to vector<8x1xf32>
    %70 = vector.broadcast %69 : vector<8x1xf32> to vector<8x128xf32>
    %71 = arith.subf %5, %70 : vector<8x128xf32>
    %72 = vector.extract_strided_slice %7 {offsets = [0, 3], sizes = [8, 1], strides = [1, 1]} : vector<8x128xf32> to vector<8x1xf32>
    %73 = vector.broadcast %72 : vector<8x1xf32> to vector<8x128xf32>
    %74 = arith.subf %7, %73 : vector<8x128xf32>
    %75 = vector.extract_strided_slice %9 {offsets = [0, 3], sizes = [8, 1], strides = [1, 1]} : vector<8x128xf32> to vector<8x1xf32>
    %76 = vector.broadcast %75 : vector<8x1xf32> to vector<8x128xf32>
    %77 = arith.subf %9, %76 : vector<8x128xf32>
    %78 = vector.extract_strided_slice %11 {offsets = [0, 3], sizes = [8, 1], strides = [1, 1]} : vector<8x128xf32> to vector<8x1xf32>
    %79 = vector.broadcast %78 : vector<8x1xf32> to vector<8x128xf32>
    %80 = arith.subf %11, %79 : vector<8x128xf32>
    %81 = arith.mulf %74, %74 : vector<8x128xf32>
    %82 = arith.mulf %77, %77 : vector<8x128xf32>
    %83 = arith.addf %81, %82 : vector<8x128xf32>
    %84 = arith.mulf %80, %80 : vector<8x128xf32>
    %85 = arith.addf %83, %84 : vector<8x128xf32>
    %cst = arith.constant 0.000000e+00 : f32
    %86 = vector.broadcast %cst : f32 to vector<8x128xf32>
    %87 = arith.subf %86, %85 : vector<8x128xf32>
    %cst_14 = arith.constant 5.000000e+01 : f32
    %88 = vector.broadcast %cst_14 : f32 to vector<8x128xf32>
    %89 = arith.divf %87, %88 : vector<8x128xf32>
    %90 = math.exp %89 : vector<8x128xf32>
    %91 = arith.subf %65, %74 : vector<8x128xf32>
    %92 = arith.subf %68, %77 : vector<8x128xf32>
    %93 = arith.subf %71, %80 : vector<8x128xf32>
    %94 = arith.mulf %91, %91 : vector<8x128xf32>
    %95 = arith.mulf %92, %92 : vector<8x128xf32>
    %96 = arith.addf %94, %95 : vector<8x128xf32>
    %97 = arith.mulf %93, %93 : vector<8x128xf32>
    %98 = arith.addf %96, %97 : vector<8x128xf32>
    %99 = arith.mulf %90, %98 : vector<8x128xf32>
    %c6 = arith.constant 6 : index
    %c0_15 = arith.constant 0 : index
    %c0_16 = arith.constant 0 : index
    %100 = vector.load %arg1[%c6, %c0_15, %c0_16] : memref<14x8x128xf32, #tpu.memory_space<vmem>>, vector<1x8x128xf32>
    %101 = vector.shape_cast %100 : vector<1x8x128xf32> to vector<8x128xf32>
    %c6_17 = arith.constant 6 : index
    %c0_18 = arith.constant 0 : index
    %c0_19 = arith.constant 0 : index
    %102 = vector.load %arg1[%c6_17, %c0_18, %c0_19] : memref<14x8x128xf32, #tpu.memory_space<vmem>>, vector<1x8x128xf32>
    %103 = vector.shape_cast %102 : vector<1x8x128xf32> to vector<8x128xf32>
    %104 = arith.mulf %101, %103 : vector<8x128xf32>
    %c7 = arith.constant 7 : index
    %c0_20 = arith.constant 0 : index
    %c0_21 = arith.constant 0 : index
    %105 = vector.load %arg1[%c7, %c0_20, %c0_21] : memref<14x8x128xf32, #tpu.memory_space<vmem>>, vector<1x8x128xf32>
    %106 = vector.shape_cast %105 : vector<1x8x128xf32> to vector<8x128xf32>
    %c7_22 = arith.constant 7 : index
    %c0_23 = arith.constant 0 : index
    %c0_24 = arith.constant 0 : index
    %107 = vector.load %arg1[%c7_22, %c0_23, %c0_24] : memref<14x8x128xf32, #tpu.memory_space<vmem>>, vector<1x8x128xf32>
    %108 = vector.shape_cast %107 : vector<1x8x128xf32> to vector<8x128xf32>
    %109 = arith.mulf %106, %108 : vector<8x128xf32>
    %110 = arith.addf %104, %109 : vector<8x128xf32>
    %c8 = arith.constant 8 : index
    %c0_25 = arith.constant 0 : index
    %c0_26 = arith.constant 0 : index
    %111 = vector.load %arg1[%c8, %c0_25, %c0_26] : memref<14x8x128xf32, #tpu.memory_space<vmem>>, vector<1x8x128xf32>
    %112 = vector.shape_cast %111 : vector<1x8x128xf32> to vector<8x128xf32>
    %c8_27 = arith.constant 8 : index
    %c0_28 = arith.constant 0 : index
    %c0_29 = arith.constant 0 : index
    %113 = vector.load %arg1[%c8_27, %c0_28, %c0_29] : memref<14x8x128xf32, #tpu.memory_space<vmem>>, vector<1x8x128xf32>
    %114 = vector.shape_cast %113 : vector<1x8x128xf32> to vector<8x128xf32>
    %115 = arith.mulf %112, %114 : vector<8x128xf32>
    %116 = arith.addf %110, %115 : vector<8x128xf32>
    %c9 = arith.constant 9 : index
    %c0_30 = arith.constant 0 : index
    %c0_31 = arith.constant 0 : index
    %117 = vector.load %arg1[%c9, %c0_30, %c0_31] : memref<14x8x128xf32, #tpu.memory_space<vmem>>, vector<1x8x128xf32>
    %118 = vector.shape_cast %117 : vector<1x8x128xf32> to vector<8x128xf32>
    %c9_32 = arith.constant 9 : index
    %c0_33 = arith.constant 0 : index
    %c0_34 = arith.constant 0 : index
    %119 = vector.load %arg1[%c9_32, %c0_33, %c0_34] : memref<14x8x128xf32, #tpu.memory_space<vmem>>, vector<1x8x128xf32>
    %120 = vector.shape_cast %119 : vector<1x8x128xf32> to vector<8x128xf32>
    %121 = arith.mulf %118, %120 : vector<8x128xf32>
    %122 = arith.addf %116, %121 : vector<8x128xf32>
    %c10 = arith.constant 10 : index
    %c0_35 = arith.constant 0 : index
    %c0_36 = arith.constant 0 : index
    %123 = vector.load %arg1[%c10, %c0_35, %c0_36] : memref<14x8x128xf32, #tpu.memory_space<vmem>>, vector<1x8x128xf32>
    %124 = vector.shape_cast %123 : vector<1x8x128xf32> to vector<8x128xf32>
    %c10_37 = arith.constant 10 : index
    %c0_38 = arith.constant 0 : index
    %c0_39 = arith.constant 0 : index
    %125 = vector.load %arg1[%c10_37, %c0_38, %c0_39] : memref<14x8x128xf32, #tpu.memory_space<vmem>>, vector<1x8x128xf32>
    %126 = vector.shape_cast %125 : vector<1x8x128xf32> to vector<8x128xf32>
    %127 = arith.mulf %124, %126 : vector<8x128xf32>
    %128 = arith.addf %122, %127 : vector<8x128xf32>
    %c11 = arith.constant 11 : index
    %c0_40 = arith.constant 0 : index
    %c0_41 = arith.constant 0 : index
    %129 = vector.load %arg1[%c11, %c0_40, %c0_41] : memref<14x8x128xf32, #tpu.memory_space<vmem>>, vector<1x8x128xf32>
    %130 = vector.shape_cast %129 : vector<1x8x128xf32> to vector<8x128xf32>
    %c11_42 = arith.constant 11 : index
    %c0_43 = arith.constant 0 : index
    %c0_44 = arith.constant 0 : index
    %131 = vector.load %arg1[%c11_42, %c0_43, %c0_44] : memref<14x8x128xf32, #tpu.memory_space<vmem>>, vector<1x8x128xf32>
    %132 = vector.shape_cast %131 : vector<1x8x128xf32> to vector<8x128xf32>
    %133 = arith.mulf %130, %132 : vector<8x128xf32>
    %134 = arith.addf %128, %133 : vector<8x128xf32>
    %c12 = arith.constant 12 : index
    %c0_45 = arith.constant 0 : index
    %c0_46 = arith.constant 0 : index
    %135 = vector.load %arg1[%c12, %c0_45, %c0_46] : memref<14x8x128xf32, #tpu.memory_space<vmem>>, vector<1x8x128xf32>
    %136 = vector.shape_cast %135 : vector<1x8x128xf32> to vector<8x128xf32>
    %c12_47 = arith.constant 12 : index
    %c0_48 = arith.constant 0 : index
    %c0_49 = arith.constant 0 : index
    %137 = vector.load %arg1[%c12_47, %c0_48, %c0_49] : memref<14x8x128xf32, #tpu.memory_space<vmem>>, vector<1x8x128xf32>
    %138 = vector.shape_cast %137 : vector<1x8x128xf32> to vector<8x128xf32>
    %139 = arith.mulf %136, %138 : vector<8x128xf32>
    %140 = arith.addf %134, %139 : vector<8x128xf32>
    %c13 = arith.constant 13 : index
    %c0_50 = arith.constant 0 : index
    %c0_51 = arith.constant 0 : index
    %141 = vector.load %arg1[%c13, %c0_50, %c0_51] : memref<14x8x128xf32, #tpu.memory_space<vmem>>, vector<1x8x128xf32>
    %142 = vector.shape_cast %141 : vector<1x8x128xf32> to vector<8x128xf32>
    %c13_52 = arith.constant 13 : index
    %c0_53 = arith.constant 0 : index
    %c0_54 = arith.constant 0 : index
    %143 = vector.load %arg1[%c13_52, %c0_53, %c0_54] : memref<14x8x128xf32, #tpu.memory_space<vmem>>, vector<1x8x128xf32>
    %144 = vector.shape_cast %143 : vector<1x8x128xf32> to vector<8x128xf32>
    %145 = arith.mulf %142, %144 : vector<8x128xf32>
    %146 = arith.addf %140, %145 : vector<8x128xf32>
    %147 = arith.addf %62, %99 : vector<8x128xf32>
    %148 = math.sqrt %146 : vector<8x128xf32>
    %cst_55 = arith.constant 0.000000e+00 : f32
    %149 = vector.broadcast %cst_55 : f32 to vector<8x128xf32>
    %150 = arith.subf %149, %148 : vector<8x128xf32>
    %151 = math.exp %150 : vector<8x128xf32>
    %152 = arith.mulf %147, %151 : vector<8x128xf32>
    %cst_56 = arith.constant dense<0x7F800000> : vector<8xf32>
    %153 = vector.multi_reduction <minimumf>, %152, %cst_56 [1] : vector<8x128xf32> to vector<8xf32>
    %154 = vector.shape_cast %153 : vector<8xf32> to vector<8x1xf32>
    %c0_57 = arith.constant 0 : index
    %c0_58 = arith.constant 0 : index
    %155 = vector.load %arg3[%c0_57, %c0_58] : memref<8x1xf32, #tpu.memory_space<vmem>>, vector<8x1xf32>
    tpu.vector_store %arg3[%c0_57, %c0_58], %154 {strides = array<i32>} : memref<8x1xf32, #tpu.memory_space<vmem>>, vector<8x1xf32>,
    return
  }
  func.func @transform_0(%arg0: i32) -> (i32, i32, i32) {
    %c0_i32 = arith.constant 0 : i32
    %c0_i32_0 = arith.constant 0 : i32
    %c0_i32_1 = arith.constant 0 : i32
    return %c0_i32, %arg0, %c0_i32_0 : i32, i32, i32
  }
  func.func @transform_1(%arg0: i32) -> (i32, i32) {
    %c0_i32 = arith.constant 0 : i32
    %c0_i32_0 = arith.constant 0 : i32
    return %arg0, %c0_i32 : i32, i32
  }
  func.func @transform_2(%arg0: i32) -> (i32, i32) {
    %c0_i32 = arith.constant 0 : i32
    %c0_i32_0 = arith.constant 0 : i32
    return %arg0, %c0_i32 : i32, i32
  }
}

</mosaic_0001>

<bundles_post_ra>
// kernel: tpu_custom_call.1
= control target key start
LH: loop header
LB: loop body
LE: loop exit
PB: predicated region body
PF: predicated region fallthrough
CT: control target
= control target key end

     0   :  { %7 = vsyncpa [#allocation3], 0  ;;  %s417_s0 = inlined_call_operand.hbm [shape: f32[14,8,128], index: 0, kind: input, shape index: {}]   ;;  %s418_s1 = inlined_call_operand.hbm [shape: f32[8,12], index: 1, kind: input, shape index: {}]   ;;  %s419_s2 = inlined_call_operand.vmem [shape: f32[8,1], index: 2, kind: output, shape index: {}]  }
   0x1   :  { %s13_s11 = sshll.u32 %s417_s0, 4  ;;  %s14_s11 = int_to_ptr.hbm [resolvable:$true] %s13_s11 }
   0x2   :  { %8 = vsyncpa [#allocation5], 0  ;;  %s340_s12 = smov [#allocation2]   ;;  %s27_s16 = sshll.u32 %s418_s1, 4  ;;  %s28_s16 = int_to_ptr.hbm [resolvable:$true] %s27_s16 }
   0x3   :  { %s15_s13 = sshll.u32 %s340_s12, 4  ;;  %s341_s17 = smov 128   ;;  %s16_s13 = int_to_ptr.vmem [resolvable:$true] %s15_s13 }
   0x4   :  { %s342_s18 = smov 8   ;;  %s343_s19 = smov [#allocation4]  }
   0x5   :  { %21 = dma.hbm_to_vmem [thread:$0]  %s14_s11, 1792, %s16_s13, [#allocation3], %s341_s17, %s341_s17, %s342_s18  }
   0x6   :  { %s29_s20 = sshll.u32 %s343_s19, 4  ;;  %s30_s20 = int_to_ptr.vmem [resolvable:$true] %s29_s20 }
   0x7   :  { %32 = dma.hbm_to_vmem [thread:$0]  %s28_s16, 128, %s30_s20, [#allocation5]  }
   0x8   :  { %336 = dma.done.wait [#allocation3], 1792  }
   0x9   :  { %337 = vsyncadd [#allocation3], 4294965504 }
   0xa   :  { %338 = dma.done.wait [#allocation5], 128  }
   0xb   :  { %339 = vsyncadd [#allocation5], 4294967168  ;;  %v344_v0 = vmov 3   ;;  %v345_v1 = vmov 2   ;;  %v346_v2 = vmov 0   ;;  %v52_v3 = vld [vmem:[#allocation4] sm:$0xff] }
   0xc   :  { %268 = vset.pattern.permute.xlu2 %v344_v0  ;;  %266 = vset.pattern.permute.xlu1 %v345_v1  ;;  %v378_v4 = vld [vmem:[#allocation2 + $0x20] sm:$0xff]  ;;  %v381_v5 = vld [vmem:[#allocation2 + $0x28] sm:$0xff]  ;;  %v383_v6 = vld [vmem:[#allocation2 + $0x18] sm:$0xff]  ;;  %v347_v7 = vmov 1   ;;  %v348_v8 = vmov 5   ;;  %v349_v9 = vmov 6  }
   0xd   :  { %264 = vset.pattern.permute.xlu0 %v346_v2  ;;  %66 = vperm.xlu1 %266, %v52_v3   ;;  %v350_v10 = vmov 4   ;;  %v387_v11 = vld [vmem:[#allocation2 + $0x8] sm:$0xff]  ;;  %v351_v12 = vmov 9   ;;  %v352_v13 = vmov 8   ;;  %v390_v14 = vld [vmem:[#allocation2] sm:$0xff]  ;;  %v353_v15 = vmov 10  }
   0xe   :  { %55 = vperm.xlu0 %264, %v52_v3   ;;  %154 = vperm.xlu2 %268, %v378_v4   ;;  %v354_v16 = vmov 7   ;;  %v393_v17 = vld [vmem:[#allocation2 + $0x10] sm:$0xff]  ;;  %v355_v18 = vmov 11   ;;  %v193_v20 = vld [vmem:[#allocation2 + $0x38] sm:$0xff]  ;;  %v197_v23 = vld [vmem:[#allocation2 + $0x40] sm:$0xff]  ;;  %v356_v50 = vmov 50.0  }
   0xf   :  { %v190_v19 = vld [vmem:[#allocation2 + $0x30] sm:$0xff]  ;;  %v194_v22 = vmul.f32 %v193_v20, %v193_v20  ;;  %v198_v25 = vmul.f32 %v197_v23, %v197_v23  ;;  %v201_v26 = vld [vmem:[#allocation2 + $0x48] sm:$0xff]  ;;  %v209_v33 = vld [vmem:[#allocation2 + $0x58] sm:$0xff]  ;;  %vm239_vm3 = vcmask 7168  }
  0x10   :  { %v191_v21 = vmul.f32 %v190_v19, %v190_v19  ;;  %v202_v28 = vmul.f32 %v201_v26, %v201_v26  ;;  %v205_v29 = vld [vmem:[#allocation2 + $0x50] sm:$0xff]  ;;  %v210_v35 = vmul.f32 %v209_v33, %v209_v33  ;;  %v213_v36 = vld [vmem:[#allocation2 + $0x60] sm:$0xff]  ;;  %v217_v40 = vld [vmem:[#allocation2 + $0x68] sm:$0xff] }
  0x11   :  { %v206_v31 = vmul.f32 %v205_v29, %v205_v29  ;;  %v214_v39 = vmul.f32 %v213_v36, %v213_v36  ;;  %v218_v42 = vmul.f32 %v217_v40, %v217_v40 }
  0x12   :  { %v195_v24 = vadd.f32 %v194_v22, %v191_v21 }
  0x14   :  { %v199_v27 = vadd.f32 %v198_v25, %v195_v24 }
  0x15   :  { %267 = vset.pattern.permute.xlu1 %v344_v0 }
  0x16   :  { %265 = vset.pattern.permute.xlu0 %v347_v7  ;;  %160 = vperm.xlu2 %268, %v381_v5   ;;  %v203_v30 = vadd.f32 %v202_v28, %v199_v27 }
  0x17   :  { %60 = vperm.xlu0 %265, %v52_v3   ;;  %148 = vperm.xlu1 %267, %v383_v6  }
  0x18   :  { %v207_v34 = vadd.f32 %v206_v31, %v203_v30 }
  0x1a   :  { %v211_v38 = vadd.f32 %v210_v35, %v207_v34 }
  0x1c   :  { %v215_v41 = vadd.f32 %v214_v39, %v211_v38 }
  0x1e   :  { %270 = vset.pattern.permute.xlu2 %v348_v8  ;;  %v219_v44 = vadd.f32 %v218_v42, %v215_v41 }
  0x1f   :  { %271 = vset.pattern.permute.xlu0 %v349_v9  ;;  %83 = vperm.xlu2 %270, %v52_v3  }
  0x20   :  { %269 = vset.pattern.permute.xlu1 %v350_v10  ;;  %89 = vperm.xlu0 %271, %v52_v3   ;;  %280 = vrsqrt.f32 %v219_v44  ;;  %vm228_vm0 = vcmp.eq.f32.partialorder %v219_v44, inf  ;;  %v231_v29 = vand.u32 2147483648, %v219_v44  ;;  %vm230_vm2 = vcmp.eq.f32.partialorder %v219_v44, 0.0 }
  0x21   :  { %78 = vperm.xlu1 %269, %v52_v3   ;;  %282 = vrcp.f32 %v356_v50 }
  0x26   :  { %v281_v48 = vpop.eup %280 }
  0x27   :  { %273 = vset.pattern.permute.xlu2 %v351_v12  ;;  %v222_v51 = vmul.f32 %v281_v48, %v219_v44  ;;  %v283_v54 = vpop.eup %282 }
  0x28   :  { %276 = vset.pattern.permute.xlu0 %v344_v0  ;;  %106 = vperm.xlu2 %273, %v52_v3   ;;  %v171_v56 = vmul.f32 50.0, %v283_v54  ;;  %vm175_vm1 = vweird.f32 %v283_v54 }
  0x29   :  { %272 = vset.pattern.permute.xlu1 %v352_v13  ;;  %136 = vperm.xlu0 %276, %v387_v11   ;;  %v223_v53 = vmul.f32 %v281_v48, %v222_v51 }
  0x2a   :  { %101 = vperm.xlu1 %272, %v52_v3   ;;  %v172_v61 = vsub.f32 1.0, %v171_v56 }
  0x2b   :  { %v224_v59 = vmul.f32 0.5, %v223_v53 }
  0x2c   :  { %v173_v7 = vmul.f32 %v283_v54, %v172_v61 }
  0x2d   :  { %v225_v63 = vsub.f32 1.5, %v224_v59 }
  0x2e   :  { %v174_v19 = vadd.f32 %v283_v54, %v173_v7 }
  0x2f   :  { %v226_v9 = vmul.f32 %v281_v48, %v225_v63 }
  0x30   :  { %275 = vset.pattern.permute.xlu2 %v344_v0  ;;  %v176_v33 = vsel %vm175_vm1, %v283_v54, %v174_v19 }
  0x31   :  { %130 = vperm.xlu2 %275, %v390_v14   ;;  %v227_v21 = vmul.f32 %v226_v9, %v219_v44 }
  0x32   :  { %274 = vset.pattern.permute.xlu1 %v353_v15 }
  0x33   :  { %112 = vperm.xlu1 %274, %v52_v3  }
  0x39   :  { %278 = vset.pattern.permute.xlu2 %v354_v16 }
  0x3a   :  { %95 = vperm.xlu2 %278, %v52_v3  }
  0x3b   :  { %277 = vset.pattern.permute.xlu1 %v344_v0 }
  0x3c   :  { %72 = vperm.xlu1 %277, %v52_v3  }
  0x42   :  { %279 = vset.pattern.permute.xlu2 %v355_v18 }
  0x43   :  { %118 = vperm.xlu2 %279, %v52_v3  }
  0x44   :  { %142 = vperm.xlu1 %277, %v393_v17  }
  0x68   :  { %v155_v32 = vpop.permute.xlu2 %154 }
  0x69   :  { %v157_v60 = vsub.f32 %v378_v4, %v155_v32  ;;  %v229_v32 = vsel %vm228_vm0, %v219_v44, %v227_v21 }
  0x6b   :  { %v165_v0 = vmul.f32 %v157_v60, %v157_v60 }
  0x70   :  { %v161_v43 = vpop.permute.xlu2 %160 }
  0x71   :  { %v163_v1 = vsub.f32 %v381_v5, %v161_v43 }
  0x73   :  { %v167_v18 = vmul.f32 %v163_v1, %v163_v1 }
  0x79   :  { %v84_v46 = vpop.permute.xlu2 %83 }
  0x7a   :  { %v86_v10 = vmul.f32 %v84_v46, %v387_v11 }
  0x7f   :  { %v67_v37 = vpop.permute.xlu1 %66 }
  0x80   :  { %v56_v47 = vpop.permute.xlu0 %55  ;;  %v69_v26 = vmul.f32 %v67_v37, %v393_v17  ;;  %v232_v37 = vsel %vm230_vm2, %v231_v29, %v229_v32 }
  0x81   :  { %v58_v12 = vmul.f32 %v56_v47, %v390_v14  ;;  %v233_v48 = vsub.f32 0.0, %v232_v37 }
  0x82   :  { %v107_v52 = vpop.permute.xlu2 %106 }
  0x83   :  { %v109_v27 = vmul.f32 %v107_v52, %v387_v11 }
  0x89   :  { %v149_v45 = vpop.permute.xlu1 %148  ;;  %v61_v55 = vpop.permute.xlu0 %60 }
  0x8a   :  { %v151_v57 = vsub.f32 %v383_v6, %v149_v45  ;;  %v63_v13 = vmul.f32 %v61_v55, %v387_v11  ;;  %v234_v55 = vmul.f32 1.442695, %v233_v48 }
  0x8b   :  { %v131_v2 = vpop.permute.xlu2 %130 }
  0x8c   :  { %v164_v62 = vmul.f32 %v151_v57, %v151_v57  ;;  %v64_v22 = vadd.f32 %v63_v13, %v58_v12  ;;  %v133_v43 = vsub.f32 %v390_v14, %v131_v2 }
  0x8e   :  { %v166_v8 = vadd.f32 %v165_v0, %v164_v62  ;;  %v70_v36 = vadd.f32 %v69_v26, %v64_v22  ;;  %v180_v51 = vsub.f32 %v133_v43, %v151_v57 }
  0x90   :  { %v168_v20 = vadd.f32 %v167_v18, %v166_v8 }
  0x92   :  { %v90_v3 = vpop.permute.xlu0 %89  ;;  %v169_v30 = vsub.f32 0.0, %v168_v20 }
  0x93   :  { %v79_v49 = vpop.permute.xlu1 %78  ;;  %v92_v24 = vmul.f32 %v90_v3, %v393_v17 }
  0x94   :  { %v81_v15 = vmul.f32 %v79_v49, %v390_v14  ;;  %v96_v25 = vpop.permute.xlu2 %95  ;;  %v177_v42 = vmul.f32 %v176_v33, %v169_v30 }
  0x96   :  { %v87_v23 = vadd.f32 %v86_v10, %v81_v15  ;;  %v178_v50 = vmul.f32 1.442695, %v177_v42 }
  0x98   :  { %v93_v34 = vadd.f32 %v92_v24, %v87_v23  ;;  %284 = vpow2.f32 %v178_v50 }
  0x99   :  { %286 = vpow2.f32 %v234_v55 }
  0x9a   :  { %v98_v45 = vadd.f32 %v96_v25, %v93_v34 }
  0x9b   :  { %v137_v31 = vpop.permute.xlu0 %136 }
  0x9c   :  { %v102_v58 = vpop.permute.xlu1 %101  ;;  %v139_v40 = vsub.f32 %v387_v11, %v137_v31  ;;  %v99_v52 = vsub.f32 %v98_v45, %v378_v4 }
  0x9d   :  { %v104_v28 = vmul.f32 %v102_v58, %v390_v14  ;;  %v119_v47 = vpop.permute.xlu2 %118  ;;  %v183_v14 = vmul.f32 %v180_v51, %v180_v51 }
  0x9e   :  { %v181_v49 = vsub.f32 %v139_v40, %v157_v60  ;;  %v124_v59 = vmul.f32 %v99_v52, %v99_v52  ;;  %v285_v4 = vpop.eup %284 }
  0x9f   :  { %v110_v39 = vadd.f32 %v109_v27, %v104_v28  ;;  %v287_v7 = vpop.eup %286 }
  0xa0   :  { %v184_v11 = vmul.f32 %v181_v49, %v181_v49 }
  0xa2   :  { %v185_v60 = vadd.f32 %v184_v11, %v183_v14 }
  0xa5   :  { %v113_v16 = vpop.permute.xlu1 %112 }
  0xa6   :  { %v115_v35 = vmul.f32 %v113_v16, %v393_v17 }
  0xa8   :  { %v116_v46 = vadd.f32 %v115_v35, %v110_v39 }
  0xaa   :  { %v121_v53 = vadd.f32 %v119_v47, %v116_v46 }
  0xac   :  { %v122_v61 = vsub.f32 %v121_v53, %v381_v5 }
  0xae   :  { %v73_v38 = vpop.permute.xlu1 %72  ;;  %v126_v57 = vmul.f32 %v122_v61, %v122_v61 }
  0xaf   :  { %v75_v41 = vadd.f32 %v73_v38, %v70_v36 }
  0xb1   :  { %v76_v44 = vsub.f32 %v75_v41, %v383_v6 }
  0xb3   :  { %v123_v56 = vmul.f32 %v76_v44, %v76_v44 }
  0xb5   :  { %v125_v6 = vadd.f32 %v124_v59, %v123_v56 }
  0xb6   :  { %v143_v54 = vpop.permute.xlu1 %142 }
  0xb7   :  { %v145_v58 = vsub.f32 %v393_v17, %v143_v54  ;;  %v127_v2 = vadd.f32 %v126_v57, %v125_v6 }
  0xb9   :  { %v182_v62 = vsub.f32 %v145_v58, %v163_v1 }
  0xbb   :  { %v186_v63 = vmul.f32 %v182_v62, %v182_v62 }
  0xbd   :  { %v187_v0 = vadd.f32 %v186_v63, %v185_v60 }
  0xbf   :  { %v188_v3 = vmul.f32 %v285_v4, %v187_v0 }
  0xc1   :  { %v220_v8 = vadd.f32 %v188_v3, %v127_v2 }
  0xc3   :  { %v236_v9 = vmul.f32 %v287_v7, %v220_v8 }
  0xc5   :  { %237 = vmin.xlane.f32.xlu0 %v236_v9 }
 0x138   :  { %v238_v17 = vpop.xlane.xlu0 %237 }
 0x139   :  { %240 = vst.msk [vmem:[%s419_s2] sm:$0xff] %vm239_vm3, %v238_v17 }
 0x13a   :  { %245 = vsyncpa [#allocation3], 1 }
 0x13b   :  { %246 = vsyncpa [#allocation5], 1 }

</bundles_post_ra>
